<compile_context>
chip_gen: v7x
topology: tpu7x:2x2x1
jax: 0.10.0
libtpu: 0.0.40
codegen_flags: <defaults>
</compile_context>

<pallas_src>
import math

import jax
import jax.numpy as jnp
from jax import lax
from jax.experimental import pallas as pl
from jax.experimental.pallas import tpu as pltpu


def _round_up(x, m):
    return ((x + m - 1) // m) * m


def _choose_edge_tile(num_edges, num_nodes):
    """Edges per grid step; keeps the per-tile [TE, N] incidence work ~8 MiB."""
    budget = 8 * 1024 * 1024
    per_row = 12 * num_nodes          # 2 x bf16 one-hots + f32 cast staging
    te = max(8, min(budget // max(1, per_row), 8192))
    te = min(te, _round_up(num_edges, 8))
    return _round_up(te, 8)


# ----------------------------------------------------------------------------
# Fused multi-layer GAT kernel
# ----------------------------------------------------------------------------
def gat_kernel(src_ref, dst_ref, emb_ref,
               ww_ref, wb_ref, a12_ref, ab_ref,
               tw_ref, tb_ref, g_ref, b_ref,
               out_ref,
               emb_sc, payload_sc, s1_sc, acc_sc):
    l_idx = pl.program_id(0)
    e_idx = pl.program_id(1)
    n_layers = pl.num_programs(0)
    n_etiles = pl.num_programs(1)

    n, d = emb_ref.shape
    te = src_ref.shape[0]

    # ------------------- per-layer init (first edge tile) --------------------
    @pl.when(e_idx == 0)
    def _init():
        @pl.when(l_idx == 0)
        def _load_emb():
            emb_sc[...] = emb_ref[...]

        cur = emb_sc[...]                                                # [N, D]
        # h = W(emb); per-node attention scores s = h @ [a1 | a2]  -> [N, 2]
        h = jnp.dot(cur, ww_ref[0], preferred_element_type=jnp.float32) + wb_ref[0]
        s = jnp.dot(h, a12_ref[0], preferred_element_type=jnp.float32)
        ones = jnp.ones((n, 1), jnp.float32)
        # dst-side gather payload: [emb | 1 | s_dst].  The "1" column yields the
        # per-edge attention-sum contribution and auto-masks padded edges.
        payload_sc[...] = jnp.concatenate([cur, ones, s[:, 1:2]],
                                          axis=1).astype(jnp.bfloat16)
        s1_sc[...] = jnp.concatenate(
            [s[:, 0:1], jnp.zeros((n, 1), jnp.float32)], axis=1
        ).astype(jnp.bfloat16)
        acc_sc[...] = jnp.zeros_like(acc_sc)

    # ------------------- edge-tile gather / scatter (every step) -------------
    src = src_ref[...]                      # [TE, 1] int32 (padded rows == N)
    dst = dst_ref[...]
    ids = lax.broadcasted_iota(jnp.int32, (te, n), 1)
    # bool -> f32 -> bf16 keeps the compare/cast path safe on chips without
    # bf16 VPU support; the MXU operands end up bf16 with f32 accumulation.
    oh_src = (ids == src).astype(jnp.float32).astype(jnp.bfloat16)       # [TE, N]
    oh_dst = (ids == dst).astype(jnp.float32).astype(jnp.bfloat16)       # [TE, N]

    gd = jnp.dot(oh_dst, payload_sc[...],
                 preferred_element_type=jnp.float32)                     # [TE, D+2]
    gs = jnp.dot(oh_src, s1_sc[...],
                 preferred_element_type=jnp.float32)                     # [TE, 2]

    # exp(leaky_relu(logit)) -- matches the PyTorch SpGAT formulation (no
    # max-subtraction), fine for these magnitudes.
    logit = gs[:, 0:1] + gd[:, d + 1:d + 2] + ab_ref[0]                  # [TE, 1]
    attn = jnp.exp(jnp.where(logit >= 0.0, logit, 0.2 * logit))

    # weighted = attn * [emb_dst | edge_mask]; scatter-add over source nodes by
    # contracting the edge axis of the SAME incidence tile (no transposed
    # one-hot is ever built).
    w = (attn * gd[:, :d + 1]).astype(jnp.bfloat16)                      # [TE, D+1]
    acc_sc[...] += lax.dot_general(
        oh_src, w, dimension_numbers=(((0,), (0,)), ((), ())),
        preferred_element_type=jnp.float32)                              # [N, D+1]

    # ------------------- per-layer finalize (last edge tile) -----------------
    @pl.when(e_idx == n_etiles - 1)
    def _finalize():
        acc = acc_sc[...]
        agg = acc[:, :d] / (acc[:, d:d + 1] + 1e-20)                     # [N, D]
        cur = emb_sc[...]
        x = jnp.concatenate([cur, agg], axis=1)                          # [N, 2D]
        pre = jnp.dot(x, tw_ref[0], preferred_element_type=jnp.float32) + tb_ref[0]
        mean = jnp.mean(pre, axis=-1, keepdims=True)
        var = jnp.mean((pre - mean) ** 2, axis=-1, keepdims=True)
        y = (pre - mean) * lax.rsqrt(var + 1e-5) * g_ref[0] + b_ref[0]

        out_ref[...] = y        # constant out block index: last layer's y wins

        @pl.when(l_idx < n_layers - 1)
        def _carry_relu():      # inter-layer ReLU from GAT.forward
            emb_sc[...] = jnp.maximum(y, 0.0)

        @pl.when(l_idx == n_layers - 1)
        def _carry_last():
            emb_sc[...] = y


# ----------------------------------------------------------------------------
# Wrapper: whole forward in one pallas_call
# ----------------------------------------------------------------------------
def gat_forward(edges, ent_emb, layer_params):
    n, d = ent_emb.shape
    num_layer = len(layer_params)
    num_edges = int(edges.shape[1])

    te = _choose_edge_tile(num_edges, n)
    n_tiles = -(-num_edges // te)
    e_pad = n_tiles * te

    edges_i32 = edges.astype(jnp.int32)
    if e_pad > num_edges:
        # sentinel node id == n matches no one-hot column -> padded edges are
        # zero rows in both the gather and the scatter.
        pad = jnp.full((2, e_pad - num_edges), n, dtype=jnp.int32)
        edges_i32 = jnp.concatenate([edges_i32, pad], axis=1)
    src_col = edges_i32[0].reshape(e_pad, 1)
    dst_col = edges_i32[1].reshape(e_pad, 1)

    # Stack per-layer parameters (leading layer axis) so the full multi-layer
    # forward is a single pallas_call and emb stays resident in VMEM.
    ww_t = jnp.stack([p["w_weight"].T for p in layer_params])               # [L, D, D]
    wb = jnp.stack([p["w_bias"].reshape(1, d) for p in layer_params])       # [L, 1, D]
    a12 = jnp.stack([jnp.stack([p["a_weight"][0, :d], p["a_weight"][0, d:]],
                               axis=1) for p in layer_params])              # [L, D, 2]
    ab = jnp.stack([p["a_bias"].reshape(1, 1) for p in layer_params])       # [L, 1, 1]
    tw = jnp.stack([p["trans_weight"].T for p in layer_params])             # [L, 2D, D]
    tb = jnp.stack([p["trans_bias"].reshape(1, d) for p in layer_params])   # [L, 1, D]
    gamma = jnp.stack([p["ln_gamma"].reshape(1, d) for p in layer_params])  # [L, 1, D]
    beta = jnp.stack([p["ln_beta"].reshape(1, d) for p in layer_params])    # [L, 1, D]

    edge_spec = pl.BlockSpec((te, 1), lambda li, ei: (ei, 0))

    def per_layer(shape):
        return pl.BlockSpec((1,) + shape, lambda li, ei: (li, 0, 0))

    grid_spec = pltpu.PrefetchScalarGridSpec(
        num_scalar_prefetch=0,
        grid=(num_layer, n_tiles),
        in_specs=[
            edge_spec, edge_spec,
            pl.BlockSpec((n, d), lambda li, ei: (0, 0)),   # initial embeddings
            per_layer((d, d)),          # W^T
            per_layer((1, d)),          # W bias
            per_layer((d, 2)),          # [a1 | a2]
            per_layer((1, 1)),          # a bias
            per_layer((2 * d, d)),      # fused trans^T for concat([emb, agg])
            per_layer((1, d)),          # trans bias
            per_layer((1, d)),          # LayerNorm gamma
            per_layer((1, d)),          # LayerNorm beta
        ],
        out_specs=pl.BlockSpec((n, d), lambda li, ei: (0, 0)),
        scratch_shapes=[
            pltpu.VMEM((n, d), jnp.float32),        # resident embedding
            pltpu.VMEM((n, d + 2), jnp.bfloat16),   # dst payload [emb | 1 | s_dst]
            pltpu.VMEM((n, 2), jnp.bfloat16),       # src score payload [s_src | 0]
            pltpu.VMEM((n, d + 1), jnp.float32),    # accumulator [agg | attn_sum]
        ],
    )

    vmem_limit = int(min(64 * 1024 * 1024,
                         max(32 * 1024 * 1024,
                             24 * te * n + 64 * n * d + 4 * 1024 * 1024)))

    return pl.pallas_call(
        gat_kernel,
        grid_spec=grid_spec,
        out_shape=jax.ShapeDtypeStruct((n, d), jnp.float32),
        compiler_params=pltpu.CompilerParams(
            # Both axes carry sequential dependencies (layer chaining and the
            # edge-tile accumulation) -> "arbitrary".
            dimension_semantics=("arbitrary", "arbitrary"),
            vmem_limit_bytes=vmem_limit,
        ),
    )(src_col, dst_col, ent_emb,
      ww_t, wb, a12, ab, tw, tb, gamma, beta)


# ----------------------------------------------------------------------------
# Parameters (mirror the PyTorch __init__ / reset_parameters shapes) + reference
# ----------------------------------------------------------------------------
def init_layer_params(key, dim):
    k = jax.random.split(key, 5)
    std_w = 1.0 / math.sqrt(dim)        # GATLayer.reset_parameters
    std_2d = 1.0 / math.sqrt(2 * dim)   # default nn.Linear bound for fan_in = 2*dim
    return {
        "w_weight": jax.random.uniform(k[0], (dim, dim), jnp.float32, -std_w, std_w),
        "w_bias": jnp.zeros((dim,), jnp.float32),
        "a_weight": jax.random.uniform(k[1], (1, 2 * dim), jnp.float32, -std_2d, std_2d),
        "a_bias": jax.random.uniform(k[2], (1,), jnp.float32, -std_2d, std_2d),
        "trans_weight": jax.random.uniform(k[3], (dim, 2 * dim), jnp.float32, -std_2d, std_2d),
        "trans_bias": jax.random.uniform(k[4], (dim,), jnp.float32, -std_2d, std_2d),
        "ln_gamma": jnp.ones((dim,), jnp.float32),
        "ln_beta": jnp.zeros((dim,), jnp.float32),
    }


def gat_reference(edges, ent_emb, layer_params):
    """Pure-JAX f32 dense reference of GAT.forward."""
    emb = ent_emb
    n, d = emb.shape
    src, dst = edges[0], edges[1]
    num_layer = len(layer_params)
    for idx, p in enumerate(layer_params):
        h = emb @ p["w_weight"].T + p["w_bias"]
        logits = (h[src] @ p["a_weight"][0, :d]
                  + h[dst] @ p["a_weight"][0, d:]
                  + p["a_bias"][0])
        attn = jnp.exp(jnp.where(logits >= 0.0, logits, 0.2 * logits))
        a_mat = jnp.zeros((n, n), jnp.float32).at[src, dst].add(attn)
        attn_sum = a_mat.sum(axis=1, keepdims=True)
        agg = (a_mat @ emb) / (attn_sum + 1e-20)
        x = jnp.concatenate([emb, agg], axis=-1)
        pre = x @ p["trans_weight"].T + p["trans_bias"]
        mean = pre.mean(-1, keepdims=True)
        var = ((pre - mean) ** 2).mean(-1, keepdims=True)
        y = (pre - mean) / jnp.sqrt(var + 1e-5) * p["ln_gamma"] + p["ln_beta"]
        emb = y if idx == num_layer - 1 else jax.nn.relu(y)
    return emb


# ----------------------------------------------------------------------------
if __name__ == "__main__":
    key = jax.random.PRNGKey(0)
    ENT_NUM = 16      # entities (nodes)
    DIM = 32          # embed_dim
    NUM_LAYER = 2
    E = 64            # number of edges

    k_emb, k_edges, k_layers = jax.random.split(key, 3)

    # nn.Embedding(ent_num + 1, dim): rows 0..ent_num-1 ~ N(0, 1/sqrt(ent_num));
    # forward only looks up arange(ent_num), so the padding row is irrelevant.
    ent_emb = jax.random.normal(k_emb, (ENT_NUM, DIM), jnp.float32) / math.sqrt(ENT_NUM)
    edges = jax.random.randint(k_edges, (2, E), 0, ENT_NUM, dtype=jnp.int32)

    layer_keys = jax.random.split(k_layers, NUM_LAYER)
    layer_params = [init_layer_params(layer_keys[i], DIM) for i in range(NUM_LAYER)]

    out = jax.block_until_ready(gat_forward(edges, ent_emb, layer_params))
    ref = jax.block_until_ready(gat_reference(edges, ent_emb, layer_params))

    assert out.shape == (ENT_NUM, DIM)
    assert bool(jnp.all(jnp.isfinite(out)))
    # bf16 one-hot gather/scatter path vs f32 dense reference (tolerance per review).
    assert bool(jnp.allclose(out, ref, rtol=5e-2, atol=5e-2)), \
        float(jnp.max(jnp.abs(out - ref)))
    print("KERNEL_OK")
</pallas_src>

<mosaic_0001>
module attributes {stable_mosaic.version = 11 : i64} {
  func.func @gat_kernel(%arg0: i32, %arg1: i32, %arg2: memref<64x1xi32, #tpu.memory_space<vmem>>, %arg3: memref<64x1xi32, #tpu.memory_space<vmem>>, %arg4: memref<16x32xf32, #tpu.memory_space<vmem>>, %arg5: memref<1x32x32xf32, #tpu.memory_space<vmem>>, %arg6: memref<1x1x32xf32, #tpu.memory_space<vmem>>, %arg7: memref<1x32x2xf32, #tpu.memory_space<vmem>>, %arg8: memref<1x1x1xf32, #tpu.memory_space<vmem>>, %arg9: memref<1x64x32xf32, #tpu.memory_space<vmem>>, %arg10: memref<1x1x32xf32, #tpu.memory_space<vmem>>, %arg11: memref<1x1x32xf32, #tpu.memory_space<vmem>>, %arg12: memref<1x1x32xf32, #tpu.memory_space<vmem>>, %arg13: memref<16x32xf32, #tpu.memory_space<vmem>>, %arg14: memref<16x32xf32, #tpu.memory_space<vmem>>, %arg15: memref<16x34xbf16, #tpu.memory_space<vmem>>, %arg16: memref<16x2xbf16, #tpu.memory_space<vmem>>, %arg17: memref<16x33xf32, #tpu.memory_space<vmem>>) attributes {dimension_semantics = [#tpu.dimension_semantics<arbitrary>, #tpu.dimension_semantics<arbitrary>], iteration_bounds = array<i64: 2, 1>, scalar_prefetch = 0 : i64, scratch_operands = 4 : i64, tpu.core_type = #tpu.core_type<tc>, window_params = [{transform_indices = @transform_0, window_bounds = array<i64: 64, 1>}, {transform_indices = @transform_1, window_bounds = array<i64: 64, 1>}, {pipeline_mode = #tpu.pipeline_mode<synchronous>, transform_indices = @transform_2, window_bounds = array<i64: 16, 32>}, {transform_indices = @transform_3, window_bounds = array<i64: 1, 32, 32>}, {transform_indices = @transform_4, window_bounds = array<i64: 1, 1, 32>}, {transform_indices = @transform_5, window_bounds = array<i64: 1, 32, 2>}, {transform_indices = @transform_6, window_bounds = array<i64: 1, 1, 1>}, {transform_indices = @transform_7, window_bounds = array<i64: 1, 64, 32>}, {transform_indices = @transform_8, window_bounds = array<i64: 1, 1, 32>}, {transform_indices = @transform_9, window_bounds = array<i64: 1, 1, 32>}, {transform_indices = @transform_10, window_bounds = array<i64: 1, 1, 32>}, {pipeline_mode = #tpu.pipeline_mode<synchronous>, transform_indices = @transform_11, window_bounds = array<i64: 16, 32>}]} {
    %c0_i32 = arith.constant 0 : i32
    %0 = arith.cmpi eq, %arg1, %c0_i32 : i32
    %1 = arith.extui %0 : i1 to i32
    %c0_i32_0 = arith.constant 0 : i32
    %2 = arith.cmpi ne, %1, %c0_i32_0 : i32
    scf.if %2 {
      %c0_i32_21 = arith.constant 0 : i32
      %44 = arith.cmpi eq, %arg0, %c0_i32_21 : i32
      %45 = arith.extui %44 : i1 to i32
      %c0_i32_22 = arith.constant 0 : i32
      %46 = arith.cmpi ne, %45, %c0_i32_22 : i32
      scf.if %46 {
        %c0_45 = arith.constant 0 : index
        %c0_46 = arith.constant 0 : index
        %70 = vector.load %arg4[%c0_45, %c0_46] : memref<16x32xf32, #tpu.memory_space<vmem>>, vector<16x32xf32>
        %c0_47 = arith.constant 0 : index
        %c0_48 = arith.constant 0 : index
        %71 = vector.load %arg14[%c0_47, %c0_48] : memref<16x32xf32, #tpu.memory_space<vmem>>, vector<16x32xf32>
        tpu.vector_store %arg14[%c0_47, %c0_48], %70 {strides = array<i32>} : memref<16x32xf32, #tpu.memory_space<vmem>>, vector<16x32xf32>,
      } else {
      }
      %c0_23 = arith.constant 0 : index
      %c0_24 = arith.constant 0 : index
      %47 = vector.load %arg14[%c0_23, %c0_24] : memref<16x32xf32, #tpu.memory_space<vmem>>, vector<16x32xf32>
      %c0_25 = arith.constant 0 : index
      %c0_26 = arith.constant 0 : index
      %c0_27 = arith.constant 0 : index
      %48 = vector.load %arg5[%c0_25, %c0_26, %c0_27] : memref<1x32x32xf32, #tpu.memory_space<vmem>>, vector<1x32x32xf32>
      %49 = vector.shape_cast %48 : vector<1x32x32xf32> to vector<32x32xf32>
      %cst_28 = arith.constant dense<0.000000e+00> : vector<16x32xf32>
      %50 = tpu.matmul %47, %49, %cst_28 {dimension_numbers = #tpu.dot_dimension_numbers<[1], [0], [0], [1], [0, 0, 1, 1], [], []>} : vector<16x32xf32>, vector<32x32xf32>, vector<16x32xf32> -> vector<16x32xf32>
      %c0_29 = arith.constant 0 : index
      %c0_30 = arith.constant 0 : index
      %c0_31 = arith.constant 0 : index
      %51 = vector.load %arg6[%c0_29, %c0_30, %c0_31] : memref<1x1x32xf32, #tpu.memory_space<vmem>>, vector<1x1x32xf32>
      %52 = vector.shape_cast %51 : vector<1x1x32xf32> to vector<1x32xf32>
      %53 = vector.broadcast %52 : vector<1x32xf32> to vector<16x32xf32>
      %54 = arith.addf %50, %53 : vector<16x32xf32>
      %c0_32 = arith.constant 0 : index
      %c0_33 = arith.constant 0 : index
      %c0_34 = arith.constant 0 : index
      %55 = vector.load %arg7[%c0_32, %c0_33, %c0_34] : memref<1x32x2xf32, #tpu.memory_space<vmem>>, vector<1x32x2xf32>
      %56 = vector.shape_cast %55 : vector<1x32x2xf32> to vector<32x2xf32>
      %cst_35 = arith.constant dense<0.000000e+00> : vector<16x2xf32>
      %57 = tpu.matmul %54, %56, %cst_35 {dimension_numbers = #tpu.dot_dimension_numbers<[1], [0], [0], [1], [0, 0, 1, 1], [], []>} : vector<16x32xf32>, vector<32x2xf32>, vector<16x2xf32> -> vector<16x2xf32>
      %cst_36 = arith.constant 1.000000e+00 : f32
      %58 = vector.broadcast %cst_36 : f32 to vector<16x1xf32>
      %59 = vector.extract_strided_slice %57 {offsets = [0, 1], sizes = [16, 1], strides = [1, 1]} : vector<16x2xf32> to vector<16x1xf32>
      %60 = tpu.concatenate %47, %58, %59 in 1 : vector<16x32xf32>, vector<16x1xf32>, vector<16x1xf32> -> vector<16x34xf32>
      %61 = arith.truncf %60 : vector<16x34xf32> to vector<16x34xbf16>
      %c0_37 = arith.constant 0 : index
      %c0_38 = arith.constant 0 : index
      %62 = vector.load %arg15[%c0_37, %c0_38] : memref<16x34xbf16, #tpu.memory_space<vmem>>, vector<16x34xbf16>
      tpu.vector_store %arg15[%c0_37, %c0_38], %61 {strides = array<i32>} : memref<16x34xbf16, #tpu.memory_space<vmem>>, vector<16x34xbf16>,
      %63 = vector.extract_strided_slice %57 {offsets = [0, 0], sizes = [16, 1], strides = [1, 1]} : vector<16x2xf32> to vector<16x1xf32>
      %cst_39 = arith.constant 0.000000e+00 : f32
      %64 = vector.broadcast %cst_39 : f32 to vector<16x1xf32>
      %65 = tpu.concatenate %63, %64 in 1 : vector<16x1xf32>, vector<16x1xf32> -> vector<16x2xf32>
      %66 = arith.truncf %65 : vector<16x2xf32> to vector<16x2xbf16>
      %c0_40 = arith.constant 0 : index
      %c0_41 = arith.constant 0 : index
      %67 = vector.load %arg16[%c0_40, %c0_41] : memref<16x2xbf16, #tpu.memory_space<vmem>>, vector<16x2xbf16>
      tpu.vector_store %arg16[%c0_40, %c0_41], %66 {strides = array<i32>} : memref<16x2xbf16, #tpu.memory_space<vmem>>, vector<16x2xbf16>,
      %cst_42 = arith.constant 0.000000e+00 : f32
      %68 = vector.broadcast %cst_42 : f32 to vector<16x33xf32>
      %c0_43 = arith.constant 0 : index
      %c0_44 = arith.constant 0 : index
      %69 = vector.load %arg17[%c0_43, %c0_44] : memref<16x33xf32, #tpu.memory_space<vmem>>, vector<16x33xf32>
      tpu.vector_store %arg17[%c0_43, %c0_44], %68 {strides = array<i32>} : memref<16x33xf32, #tpu.memory_space<vmem>>, vector<16x33xf32>,
    } else {
    }
    %c0 = arith.constant 0 : index
    %c0_1 = arith.constant 0 : index
    %3 = vector.load %arg2[%c0, %c0_1] : memref<64x1xi32, #tpu.memory_space<vmem>>, vector<64x1xi32>
    %c0_2 = arith.constant 0 : index
    %c0_3 = arith.constant 0 : index
    %4 = vector.load %arg3[%c0_2, %c0_3] : memref<64x1xi32, #tpu.memory_space<vmem>>, vector<64x1xi32>
    %5 = tpu.iota {dimensions = array<i32: 1>} : vector<64x16xi32>
    %6 = vector.broadcast %3 : vector<64x1xi32> to vector<64x16xi32>
    %7 = arith.cmpi eq, %5, %6 : vector<64x16xi32>
    %8 = arith.extui %7 : vector<64x16xi1> to vector<64x16xi32>
    %9 = arith.sitofp %8 : vector<64x16xi32> to vector<64x16xf32>
    %10 = arith.truncf %9 : vector<64x16xf32> to vector<64x16xbf16>
    %11 = vector.broadcast %4 : vector<64x1xi32> to vector<64x16xi32>
    %12 = arith.cmpi eq, %5, %11 : vector<64x16xi32>
    %13 = arith.extui %12 : vector<64x16xi1> to vector<64x16xi32>
    %14 = arith.sitofp %13 : vector<64x16xi32> to vector<64x16xf32>
    %15 = arith.truncf %14 : vector<64x16xf32> to vector<64x16xbf16>
    %c0_4 = arith.constant 0 : index
    %c0_5 = arith.constant 0 : index
    %16 = vector.load %arg15[%c0_4, %c0_5] : memref<16x34xbf16, #tpu.memory_space<vmem>>, vector<16x34xbf16>
    %cst = arith.constant dense<0.000000e+00> : vector<64x34xf32>
    %17 = tpu.matmul %15, %16, %cst {dimension_numbers = #tpu.dot_dimension_numbers<[1], [0], [0], [1], [0, 0, 1, 1], [], []>} : vector<64x16xbf16>, vector<16x34xbf16>, vector<64x34xf32> -> vector<64x34xf32>
    %c0_6 = arith.constant 0 : index
    %c0_7 = arith.constant 0 : index
    %18 = vector.load %arg16[%c0_6, %c0_7] : memref<16x2xbf16, #tpu.memory_space<vmem>>, vector<16x2xbf16>
    %cst_8 = arith.constant dense<0.000000e+00> : vector<64x2xf32>
    %19 = tpu.matmul %10, %18, %cst_8 {dimension_numbers = #tpu.dot_dimension_numbers<[1], [0], [0], [1], [0, 0, 1, 1], [], []>} : vector<64x16xbf16>, vector<16x2xbf16>, vector<64x2xf32> -> vector<64x2xf32>
    %20 = vector.extract_strided_slice %19 {offsets = [0, 0], sizes = [64, 1], strides = [1, 1]} : vector<64x2xf32> to vector<64x1xf32>
    %21 = vector.extract_strided_slice %17 {offsets = [0, 33], sizes = [64, 1], strides = [1, 1]} : vector<64x34xf32> to vector<64x1xf32>
    %22 = arith.addf %20, %21 : vector<64x1xf32>
    %c0_9 = arith.constant 0 : index
    %c0_10 = arith.constant 0 : index
    %c0_11 = arith.constant 0 : index
    %23 = vector.load %arg8[%c0_9, %c0_10, %c0_11] : memref<1x1x1xf32, #tpu.memory_space<vmem>>, vector<1x1x1xf32>
    %24 = vector.shape_cast %23 : vector<1x1x1xf32> to vector<1x1xf32>
    %25 = vector.broadcast %24 : vector<1x1xf32> to vector<64x1xf32>
    %26 = arith.addf %22, %25 : vector<64x1xf32>
    %cst_12 = arith.constant 0.000000e+00 : f32
    %27 = vector.broadcast %cst_12 : f32 to vector<64x1xf32>
    %28 = arith.cmpf oge, %26, %27 : vector<64x1xf32>
    %cst_13 = arith.constant 2.000000e-01 : f32
    %29 = vector.broadcast %cst_13 : f32 to vector<64x1xf32>
    %30 = arith.mulf %29, %26 : vector<64x1xf32>
    %31 = arith.select %28, %26, %30 : vector<64x1xi1>, vector<64x1xf32>
    %32 = math.exp %31 : vector<64x1xf32>
    %33 = vector.extract_strided_slice %17 {offsets = [0, 0], sizes = [64, 33], strides = [1, 1]} : vector<64x34xf32> to vector<64x33xf32>
    %34 = vector.broadcast %32 : vector<64x1xf32> to vector<64x33xf32>
    %35 = arith.mulf %34, %33 : vector<64x33xf32>
    %36 = arith.truncf %35 : vector<64x33xf32> to vector<64x33xbf16>
    %c0_14 = arith.constant 0 : index
    %c0_15 = arith.constant 0 : index
    %37 = vector.load %arg17[%c0_14, %c0_15] : memref<16x33xf32, #tpu.memory_space<vmem>>, vector<16x33xf32>
    %cst_16 = arith.constant dense<0.000000e+00> : vector<16x33xf32>
    %38 = tpu.matmul %10, %36, %cst_16 {dimension_numbers = #tpu.dot_dimension_numbers<[0], [0], [1], [1], [0, 1, 1, 1], [], []>} : vector<64x16xbf16>, vector<64x33xbf16>, vector<16x33xf32> -> vector<16x33xf32>
    %39 = arith.addf %37, %38 : vector<16x33xf32>
    %c0_17 = arith.constant 0 : index
    %c0_18 = arith.constant 0 : index
    %40 = vector.load %arg17[%c0_17, %c0_18] : memref<16x33xf32, #tpu.memory_space<vmem>>, vector<16x33xf32>
    tpu.vector_store %arg17[%c0_17, %c0_18], %39 {strides = array<i32>} : memref<16x33xf32, #tpu.memory_space<vmem>>, vector<16x33xf32>,
    %c0_i32_19 = arith.constant 0 : i32
    %41 = arith.cmpi eq, %arg1, %c0_i32_19 : i32
    %42 = arith.extui %41 : i1 to i32
    %c0_i32_20 = arith.constant 0 : i32
    %43 = arith.cmpi ne, %42, %c0_i32_20 : i32
    scf.if %43 {
      %c0_21 = arith.constant 0 : index
      %c0_22 = arith.constant 0 : index
      %44 = vector.load %arg17[%c0_21, %c0_22] : memref<16x33xf32, #tpu.memory_space<vmem>>, vector<16x33xf32>
      %45 = vector.extract_strided_slice %44 {offsets = [0, 0], sizes = [16, 32], strides = [1, 1]} : vector<16x33xf32> to vector<16x32xf32>
      %46 = vector.extract_strided_slice %44 {offsets = [0, 32], sizes = [16, 1], strides = [1, 1]} : vector<16x33xf32> to vector<16x1xf32>
      %cst_23 = arith.constant 9.99999968E-21 : f32
      %47 = vector.broadcast %cst_23 : f32 to vector<16x1xf32>
      %48 = arith.addf %46, %47 : vector<16x1xf32>
      %49 = vector.broadcast %48 : vector<16x1xf32> to vector<16x32xf32>
      %50 = arith.divf %45, %49 : vector<16x32xf32>
      %c0_24 = arith.constant 0 : index
      %c0_25 = arith.constant 0 : index
      %51 = vector.load %arg14[%c0_24, %c0_25] : memref<16x32xf32, #tpu.memory_space<vmem>>, vector<16x32xf32>
      %52 = tpu.concatenate %51, %50 in 1 : vector<16x32xf32>, vector<16x32xf32> -> vector<16x64xf32>
      %c0_26 = arith.constant 0 : index
      %c0_27 = arith.constant 0 : index
      %c0_28 = arith.constant 0 : index
      %53 = vector.load %arg9[%c0_26, %c0_27, %c0_28] : memref<1x64x32xf32, #tpu.memory_space<vmem>>, vector<1x64x32xf32>
      %54 = vector.shape_cast %53 : vector<1x64x32xf32> to vector<64x32xf32>
      %cst_29 = arith.constant dense<0.000000e+00> : vector<16x32xf32>
      %55 = tpu.matmul %52, %54, %cst_29 {dimension_numbers = #tpu.dot_dimension_numbers<[1], [0], [0], [1], [0, 0, 1, 1], [], []>} : vector<16x64xf32>, vector<64x32xf32>, vector<16x32xf32> -> vector<16x32xf32>
      %c0_30 = arith.constant 0 : index
      %c0_31 = arith.constant 0 : index
      %c0_32 = arith.constant 0 : index
      %56 = vector.load %arg10[%c0_30, %c0_31, %c0_32] : memref<1x1x32xf32, #tpu.memory_space<vmem>>, vector<1x1x32xf32>
      %57 = vector.shape_cast %56 : vector<1x1x32xf32> to vector<1x32xf32>
      %58 = vector.broadcast %57 : vector<1x32xf32> to vector<16x32xf32>
      %59 = arith.addf %55, %58 : vector<16x32xf32>
      %cst_33 = arith.constant dense<0.000000e+00> : vector<16xf32>
      %60 = vector.multi_reduction <add>, %59, %cst_33 [1] : vector<16x32xf32> to vector<16xf32>
      %61 = vector.shape_cast %60 : vector<16xf32> to vector<16x1xf32>
      %cst_34 = arith.constant 3.200000e+01 : f32
      %62 = vector.broadcast %cst_34 : f32 to vector<16x1xf32>
      %63 = arith.divf %61, %62 : vector<16x1xf32>
      %64 = vector.broadcast %63 : vector<16x1xf32> to vector<16x32xf32>
      %65 = arith.subf %59, %64 : vector<16x32xf32>
      %66 = arith.mulf %65, %65 : vector<16x32xf32>
      %cst_35 = arith.constant dense<0.000000e+00> : vector<16xf32>
      %67 = vector.multi_reduction <add>, %66, %cst_35 [1] : vector<16x32xf32> to vector<16xf32>
      %68 = vector.shape_cast %67 : vector<16xf32> to vector<16x1xf32>
      %cst_36 = arith.constant 3.200000e+01 : f32
      %69 = vector.broadcast %cst_36 : f32 to vector<16x1xf32>
      %70 = arith.divf %68, %69 : vector<16x1xf32>
      %71 = vector.broadcast %63 : vector<16x1xf32> to vector<16x32xf32>
      %72 = arith.subf %59, %71 : vector<16x32xf32>
      %cst_37 = arith.constant 9.99999974E-6 : f32
      %73 = vector.broadcast %cst_37 : f32 to vector<16x1xf32>
      %74 = arith.addf %70, %73 : vector<16x1xf32>
      %75 = math.rsqrt %74 : vector<16x1xf32>
      %76 = vector.broadcast %75 : vector<16x1xf32> to vector<16x32xf32>
      %77 = arith.mulf %72, %76 : vector<16x32xf32>
      %c0_38 = arith.constant 0 : index
      %c0_39 = arith.constant 0 : index
      %c0_40 = arith.constant 0 : index
      %78 = vector.load %arg11[%c0_38, %c0_39, %c0_40] : memref<1x1x32xf32, #tpu.memory_space<vmem>>, vector<1x1x32xf32>
      %79 = vector.shape_cast %78 : vector<1x1x32xf32> to vector<1x32xf32>
      %80 = vector.broadcast %79 : vector<1x32xf32> to vector<16x32xf32>
      %81 = arith.mulf %77, %80 : vector<16x32xf32>
      %c0_41 = arith.constant 0 : index
      %c0_42 = arith.constant 0 : index
      %c0_43 = arith.constant 0 : index
      %82 = vector.load %arg12[%c0_41, %c0_42, %c0_43] : memref<1x1x32xf32, #tpu.memory_space<vmem>>, vector<1x1x32xf32>
      %83 = vector.shape_cast %82 : vector<1x1x32xf32> to vector<1x32xf32>
      %84 = vector.broadcast %83 : vector<1x32xf32> to vector<16x32xf32>
      %85 = arith.addf %81, %84 : vector<16x32xf32>
      %c0_44 = arith.constant 0 : index
      %c0_45 = arith.constant 0 : index
      %86 = vector.load %arg13[%c0_44, %c0_45] : memref<16x32xf32, #tpu.memory_space<vmem>>, vector<16x32xf32>
      tpu.vector_store %arg13[%c0_44, %c0_45], %85 {strides = array<i32>} : memref<16x32xf32, #tpu.memory_space<vmem>>, vector<16x32xf32>,
      %c1_i32 = arith.constant 1 : i32
      %87 = arith.cmpi slt, %arg0, %c1_i32 : i32
      %88 = arith.extui %87 : i1 to i32
      %c0_i32_46 = arith.constant 0 : i32
      %89 = arith.cmpi ne, %88, %c0_i32_46 : i32
      scf.if %89 {
        %cst_49 = arith.constant 0.000000e+00 : f32
        %93 = vector.broadcast %cst_49 : f32 to vector<16x32xf32>
        %94 = arith.maximumf %85, %93 : vector<16x32xf32>
        %c0_50 = arith.constant 0 : index
        %c0_51 = arith.constant 0 : index
        %95 = vector.load %arg14[%c0_50, %c0_51] : memref<16x32xf32, #tpu.memory_space<vmem>>, vector<16x32xf32>
        tpu.vector_store %arg14[%c0_50, %c0_51], %94 {strides = array<i32>} : memref<16x32xf32, #tpu.memory_space<vmem>>, vector<16x32xf32>,
      } else {
      }
      %c1_i32_47 = arith.constant 1 : i32
      %90 = arith.cmpi eq, %arg0, %c1_i32_47 : i32
      %91 = arith.extui %90 : i1 to i32
      %c0_i32_48 = arith.constant 0 : i32
      %92 = arith.cmpi ne, %91, %c0_i32_48 : i32
      scf.if %92 {
        %c0_49 = arith.constant 0 : index
        %c0_50 = arith.constant 0 : index
        %93 = vector.load %arg14[%c0_49, %c0_50] : memref<16x32xf32, #tpu.memory_space<vmem>>, vector<16x32xf32>
        tpu.vector_store %arg14[%c0_49, %c0_50], %85 {strides = array<i32>} : memref<16x32xf32, #tpu.memory_space<vmem>>, vector<16x32xf32>,
      } else {
      }
    } else {
    }
    return
  }
  func.func @transform_0(%arg0: i32, %arg1: i32) -> (i32, i32) {
    %c0_i32 = arith.constant 0 : i32
    %c0_i32_0 = arith.constant 0 : i32
    return %arg1, %c0_i32 : i32, i32
  }
  func.func @transform_1(%arg0: i32, %arg1: i32) -> (i32, i32) {
    %c0_i32 = arith.constant 0 : i32
    %c0_i32_0 = arith.constant 0 : i32
    return %arg1, %c0_i32 : i32, i32
  }
  func.func @transform_2(%arg0: i32, %arg1: i32) -> (i32, i32) {
    %c0_i32 = arith.constant 0 : i32
    %c0_i32_0 = arith.constant 0 : i32
    %c0_i32_1 = arith.constant 0 : i32
    return %c0_i32, %c0_i32_0 : i32, i32
  }
  func.func @transform_3(%arg0: i32, %arg1: i32) -> (i32, i32, i32) {
    %c0_i32 = arith.constant 0 : i32
    %c0_i32_0 = arith.constant 0 : i32
    %c0_i32_1 = arith.constant 0 : i32
    return %arg0, %c0_i32, %c0_i32_0 : i32, i32, i32
  }
  func.func @transform_4(%arg0: i32, %arg1: i32) -> (i32, i32, i32) {
    %c0_i32 = arith.constant 0 : i32
    %c0_i32_0 = arith.constant 0 : i32
    %c0_i32_1 = arith.constant 0 : i32
    return %arg0, %c0_i32, %c0_i32_0 : i32, i32, i32
  }
  func.func @transform_5(%arg0: i32, %arg1: i32) -> (i32, i32, i32) {
    %c0_i32 = arith.constant 0 : i32
    %c0_i32_0 = arith.constant 0 : i32
    %c0_i32_1 = arith.constant 0 : i32
    return %arg0, %c0_i32, %c0_i32_0 : i32, i32, i32
  }
  func.func @transform_6(%arg0: i32, %arg1: i32) -> (i32, i32, i32) {
    %c0_i32 = arith.constant 0 : i32
    %c0_i32_0 = arith.constant 0 : i32
    %c0_i32_1 = arith.constant 0 : i32
    return %arg0, %c0_i32, %c0_i32_0 : i32, i32, i32
  }
  func.func @transform_7(%arg0: i32, %arg1: i32) -> (i32, i32, i32) {
    %c0_i32 = arith.constant 0 : i32
    %c0_i32_0 = arith.constant 0 : i32
    %c0_i32_1 = arith.constant 0 : i32
    return %arg0, %c0_i32, %c0_i32_0 : i32, i32, i32
  }
  func.func @transform_8(%arg0: i32, %arg1: i32) -> (i32, i32, i32) {
    %c0_i32 = arith.constant 0 : i32
    %c0_i32_0 = arith.constant 0 : i32
    %c0_i32_1 = arith.constant 0 : i32
    return %arg0, %c0_i32, %c0_i32_0 : i32, i32, i32
  }
  func.func @transform_9(%arg0: i32, %arg1: i32) -> (i32, i32, i32) {
    %c0_i32 = arith.constant 0 : i32
    %c0_i32_0 = arith.constant 0 : i32
    %c0_i32_1 = arith.constant 0 : i32
    return %arg0, %c0_i32, %c0_i32_0 : i32, i32, i32
  }
  func.func @transform_10(%arg0: i32, %arg1: i32) -> (i32, i32, i32) {
    %c0_i32 = arith.constant 0 : i32
    %c0_i32_0 = arith.constant 0 : i32
    %c0_i32_1 = arith.constant 0 : i32
    return %arg0, %c0_i32, %c0_i32_0 : i32, i32, i32
  }
  func.func @transform_11(%arg0: i32, %arg1: i32) -> (i32, i32) {
    %c0_i32 = arith.constant 0 : i32
    %c0_i32_0 = arith.constant 0 : i32
    %c0_i32_1 = arith.constant 0 : i32
    return %c0_i32, %c0_i32_0 : i32, i32
  }
}

</mosaic_0001>

<bundles_post_ra>
// kernel: tpu_custom_call.1
= control target key start
LH: loop header
LB: loop body
LE: loop exit
PB: predicated region body
PF: predicated region fallthrough
CT: control target
= control target key end

     0   :  { %s2321_s0 = inlined_call_operand.vmem [shape: s32[64,1], index: 0, kind: input, shape index: {}]   ;;  %s2322_s1 = inlined_call_operand.vmem [shape: s32[64,1], index: 1, kind: input, shape index: {}]   ;;  %s2323_s2 = inlined_call_operand.vmem [shape: f32[16,32], index: 2, kind: input, shape index: {}]   ;;  %s2324_s3 = inlined_call_operand.vmem [shape: f32[2,32,32], index: 3, kind: input, shape index: {}]   ;;  %s2325_s4 = inlined_call_operand.vmem [shape: f32[2,1,32], index: 4, kind: input, shape index: {}]   ;;  %s2326_s5 = inlined_call_operand.vmem [shape: f32[2,32,2], index: 5, kind: input, shape index: {}]   ;;  %s2327_s6 = inlined_call_operand.vmem [shape: f32[2,1,1], index: 6, kind: input, shape index: {}]   ;;  %s2328_s7 = inlined_call_operand.vmem [shape: f32[2,64,32], index: 7, kind: input, shape index: {}]   ;;  %s2329_s8 = inlined_call_operand.vmem [shape: f32[2,1,32], index: 8, kind: input, shape index: {}]   ;;  %s2330_s9 = inlined_call_operand.vmem [shape: f32[2,1,32], index: 9, kind: input, shape index: {}]   ;;  %s2331_s10 = inlined_call_operand.vmem [shape: f32[2,1,32], index: 10, kind: input, shape index: {}]   ;;  %s2332_s11 = inlined_call_operand.hbm [shape: f32[16,32], index: 11, kind: output, shape index: {}]  }
   0x1   :  { %2335 = sst [smem:[#allocation11_spill]] %s2324_s3 }
   0x2   :  { %2336 = sst [smem:[#allocation12_spill]] %s2332_s11 }
   0x3   :  { %16 = vsyncpa [#allocation7], 0  ;;  %s1993_s17 = smov 0   ;;  %s1995_s18 = smov 0  }
   0x4   :  { %s1997_s19 = smov 0  }
   0x5 LB: > { %2337 = sst [smem:[#allocation9_spill]] %s1918_s18  ;;  %s34_s21 = sadd.s32 1, %s1918_s18  ;;  %s1922_s19 = sphi %s1997_s19, %s22_s19   ;;  %s1918_s18 = sphi %s1995_s18, %s2345_s18   ;;  %s1914_s17 = sphi %s1993_s17, %s2344_s17  }
   0x6   : > { %p36_p0 = scmp.ge.s32.totalorder %s34_s21, 2  ;;  %p1603_p1 = scmp.ge.s32.totalorder %s1922_s19, 1 }
   0x7   : > { %p427_p2 = scmp.lt.s32.totalorder %s1922_s19, 3 }
   0x8   : > { %s2347_s21 = smov (%p36_p0, %s34_s21), 0 }
   0x9   : > { %2338 = sst [smem:[#allocation10_spill]] %s2347_s21  ;;  %p428_p3 = pnand %p1603_p1, %p427_p2 }
   0xa   : > { %p509_p4 = scmp.lt.s32.totalorder (!%p428_p3), %s1914_s17, 1  ;;  %s2339_s3 = sld [smem:[#allocation11_spill]] (!%p428_p3) }
   0xb   : > { %431 = sbr.rel (%p428_p3) target bundleno = 2165 (0x875), region = 64  ;;  %p1610_p5 = scmp.ne.s32.totalorder (!%p428_p3), %s1914_s17, 0 }
  0x12   : > { %s2016_s22 = scalar_select %p509_p4, %s1914_s17, 1 }
  0x13   : > { %547 = sbr.rel (%p1610_p5) target bundleno = 26 (0x1a), region = 72  ;;  %v548_v0 = vld [vmem:[%s2323_s2] sm:$0xff] (!%p1610_p5)  ;;  %vm550_vm0 = vcmask (!%p1610_p5), 261120   ;;  %v549_v1 = vld [vmem:[%s2323_s2 + $0x8] sm:$0xff] (!%p1610_p5) }
  0x14   : > { %s1653_s23 = sshll.u32 %s2016_s22, 5  ;;  %s524_s16 = scalar_lea.vmem %s2327_s6, %s2016_s22  ;;  %551 = vst.msk [vmem:[#allocation2] sm:$0xff] (!%p1610_p5), %vm550_vm0, %v548_v0  ;;  %552 = vst.msk [vmem:[#allocation2 + $0x8] sm:$0xff] (!%p1610_p5), %vm550_vm0, %v549_v1 }
  0x15   : > { %s513_s29 = scalar_lea.vmem %s2339_s3, %s1653_s23  ;;  %s2029_s13 = scalar_lea.vmem %s2326_s5, %s1653_s23 }
  0x16   : > { %s1655_s20 = sshll.u32 %s2016_s22, 6  ;;  %s532_s27 = scalar_lea.vmem %s2329_s8, %s2016_s22 }
  0x17   : > { %s2039_s11 = scalar_lea.vmem %s2328_s7, %s1655_s20  ;;  %s535_s30 = scalar_lea.vmem %s2330_s9, %s2016_s22 }
  0x18   : > { %s538_s3 = scalar_lea.vmem %s2331_s10, %s2016_s22 }
  0x1a PF: > { %v555_v2 = vld [vmem:[%s513_s29] sm:$0xff]  ;;  %v556_v3 = vld [vmem:[%s513_s29 + $0x8] sm:$0xff]  ;;  %v557_v4 = vld [vmem:[%s513_s29 + $0x10] sm:$0xff]  ;;  %vm566_vm1 = vcmask 261120   ;;  %v1924_v17 = vmov 0   ;;  %s2340_s28 = scalar_lea.vmem %s2325_s4, %s2016_s22  ;;  %vm743_vm2 = vcmask 269312   ;;  %v773_v57 = vlaneseq }
  0x1b   : > { %v1766_v5 = vpack.c.bf16 %v556_v3, %v555_v2  ;;  %v558_v6 = vld [vmem:[%s513_s29 + $0x18] sm:$0xff]  ;;  %v2060_v7 = vld [vmem:[#allocation2] sm:$0xff]  ;;  %v649_v10 = vld [vmem:[%s2029_s13 + $0x8] sm:$0xff]  ;;  %1843 = vset.pattern.permute.xlu1 %v1924_v17  ;;  %1842 = vset.pattern.permute.xlu0 %v1924_v17  ;;  %v1925_v31 = vmov 0.0   ;;  %vm749_vm3 = vcmask 7168   ;;  %vm753_vm4 = vcmask 15360  }
  0x1c   : > { %v1770_v8 = vpack.c.bf16 %v558_v6, %v557_v4  ;;  %1701 = vmatprep.mubr.msk.f32.mxu0 %vm566_vm1, %v2060_v7  ;;  %v648_v9 = vld [vmem:[%s2029_s13] sm:$0xff]  ;;  %v2066_v12 = vld [vmem:[#allocation2 + $0x8] sm:$0xff]  ;;  %v650_v13 = vld [vmem:[%s2029_s13 + $0x10] sm:$0xff]  ;;  %755 = vst.msk [vmem:[#allocation5] sm:$0xff] %vm743_vm2, %v1925_v31  ;;  %s1926_s12 = smov 32   ;;  %v741_v48 = vsel %vm566_vm1, %v2060_v7, 1.0 }
  0x1d   : > { %1767 = vmatprep.subr.bf16.mxu0 %v1766_v5  ;;  %v1774_v11 = vpack.c.bf16 %v649_v10, %v648_v9  ;;  %v651_v14 = vld [vmem:[%s2029_s13 + $0x18] sm:$0xff]  ;;  %v766_v16 = vld [vmem:[%s2322_s1 + $0x8] sm:$0xff]  ;;  %v767_v18 = vld [vmem:[%s2322_s1 + $0x10] sm:$0xff]  ;;  %756 = vst.msk [vmem:[#allocation5 + $0x8] sm:$0xff] %vm743_vm2, %v1925_v31  ;;  %v742_v49 = vsel %vm566_vm1, %v2066_v12, 1.0  ;;  %vm747_vm5 = vcmask 277504  }
  0x1e   : > { %1769 = vmatpush3.bf16.msra.mxu0 %v1766_v5  ;;  %v1778_v15 = vpack.c.bf16 %v651_v14, %v650_v13  ;;  %831 = vperm.xlu1 %1843, %v766_v16   ;;  %v768_v19 = vld [vmem:[%s2322_s1 + $0x18] sm:$0xff]  ;;  %v770_v20 = vld [vmem:[%s2322_s1 + $0x28] sm:$0xff]  ;;  %v1611_v25 = vld [vmem:[%s2340_s28] ss:$0 sm:$0xff]  ;;  %v2138_v59 = vand.u32 127, %v773_v57  ;;  %vm880_vm10 = vcmask 130048  }
  0x1f   : > { %1771 = vmatprep.subr.bf16.mxu0 %v1770_v8  ;;  %1775 = vmatprep.subr.bf16.mxu1 %v1774_v11  ;;  %v772_v21 = vld [vmem:[%s2322_s1 + $0x38] sm:$0xff]  ;;  %v758_v22 = vld [vmem:[%s2321_s0 + $0x8] sm:$0xff]  ;;  %v765_v38 = vld [vmem:[%s2322_s1] sm:$0xff]  ;;  %s1927_s18 = smov 95   ;;  %p1647_p6 = scmp.ge.s32.totalorder %s1914_s17, 1 }
  0x20   : > { %1777 = vmatpush3.bf16.msra.mxu1 %v1774_v11  ;;  %v760_v23 = vld [vmem:[%s2321_s0 + $0x18] sm:$0xff]  ;;  %v762_v24 = vld [vmem:[%s2321_s0 + $0x28] sm:$0xff]  ;;  %v769_v39 = vld [vmem:[%s2322_s1 + $0x20] sm:$0xff] }
  0x21   : > { %1779 = vmatprep.subr.bf16.mxu1 %v1778_v15  ;;  %v764_v30 = vld [vmem:[%s2321_s0 + $0x38] sm:$0xff]  ;;  %v771_v41 = vld [vmem:[%s2322_s1 + $0x30] sm:$0xff]  ;;  %v757_v42 = vld [vmem:[%s2321_s0] sm:$0xff] }
  0x22   : > { %1773 = vmatpush3.bf16.msra.mxu0 %v1770_v8  ;;  %834 = vperm.xlu1 %1843, %v767_v18   ;;  %v759_v43 = vld [vmem:[%s2321_s0 + $0x10] sm:$0xff]  ;;  %v761_v44 = vld [vmem:[%s2321_s0 + $0x20] sm:$0xff] }
  0x23   : > { %v763_v45 = vld [vmem:[%s2321_s0 + $0x30] sm:$0xff] }
  0x24   : > { %1781 = vmatpush3.bf16.msra.mxu1 %v1778_v15 }
  0x25   : > { %1702 = vmatmul.mubr.msk.f32.vlgmr.msra.gmra.mrb[0].mxu0 %vm566_vm1, %v2066_v12 }
  0x26   : > { %837 = vperm.xlu1 %1843, %v768_v19  }
  0x2a   : > { %843 = vperm.xlu1 %1843, %v770_v20  }
  0x2e   : > { %849 = vperm.xlu1 %1843, %v772_v21  }
  0x32   : > { %779 = vperm.xlu1 %1843, %v758_v22  }
  0x36   : > { %785 = vperm.xlu1 %1843, %v760_v23  }
  0x3a   : > { %791 = vperm.xlu1 %1843, %v762_v24  }
  0x3e   : > { %797 = vperm.xlu1 %1843, %v764_v30  }
  0x9d   : > { %v832_v46 = vpop.permute.xlu1 %831 }
  0x9e   : > { %vm852_vm8 = vcmp.eq.s32.totalorder %v2138_v59, %v832_v46 }
  0x9f   : > { %v1625_v1 = vsel %vm852_vm8, 1.0, %v1925_v31 }
  0xa1   : > { %v835_v47 = vpop.permute.xlu1 %834 }
  0xa2   : > { %vm853_vm6 = vcmp.eq.s32.totalorder %v2138_v59, %v835_v47 }
  0xa3   : > { %v1626_v63 = vsel %vm853_vm6, 1.0, %v1925_v31 }
  0xa5   : > { %v838_v51 = vpop.permute.xlu1 %837 }
  0xa6   : > { %vm854_vm7 = vcmp.eq.s32.totalorder %v2138_v59, %v838_v51 }
  0xa7   : > { %v1627_v0 = vsel %vm854_vm7, 1.0, %v1925_v31 }
  0xa8   : > { %v876_v5 = vpack.c.bf16 %v1627_v0, %v1626_v63 }
  0xa9   : > { %v844_v58 = vpop.permute.xlu1 %843 }
  0xaa   : > { %vm856_vm11 = vcmp.eq.s32.totalorder %v2138_v59, %v844_v58 }
  0xab   : > { %v1629_v8 = vsel %vm856_vm11, 1.0, %v1925_v31 }
  0xad   : > { %v850_v60 = vpop.permute.xlu1 %849 }
  0xae   : > { %vm858_vm13 = vcmp.eq.s32.totalorder %v2138_v59, %v850_v60 }
  0xaf   : > { %v1631_v14 = vsel %vm858_vm13, 1.0, %v1925_v31 }
  0xb1   : > { %v780_v2 = vpop.permute.xlu1 %779 }
  0xb2   : > { %vm800_vm15 = vcmp.eq.s32.totalorder %v2138_v59, %v780_v2 }
  0xb3   : > { %v1617_v18 = vsel %vm800_vm15, 1.0, %v1925_v31 }
  0xb5   : > { %v786_v11 = vpop.permute.xlu1 %785 }
  0xb9   : > { %v792_v19 = vpop.permute.xlu1 %791 }
  0xf8   : > { %v1703_v26 = vpop.f32.mrb[0].mxu0 }
  0xf9   : > { %v639_v27 = vpop.f32.mrb[1].mxu0  ;;  %v645_v29 = vadd.f32 %v1703_v26, %v1611_v25  ;;  %v798_v26 = vpop.permute.xlu1 %797 }
  0xfa   : > { %v640_v28 = vadd.f32 %v1611_v25, %v639_v27  ;;  %vm806_vm7 = vcmp.eq.s32.totalorder %v2138_v59, %v798_v26 }
  0xfc   : > { %1712 = vmatprep.mubr.msk.f32.mxu1 %vm566_vm1, %v640_v28 }
  0xfd   : > { %1713 = vmatmul.mubr.msk.f32.vlgmr.msra.gmra.mrb[0].mxu1 %vm566_vm1, %v645_v29 }
 0x1d0   : > { %v1714_v32 = vpop.f32.mrb[0].mxu1 }
 0x1d1   : > { %v751_v33 = vsel %vm749_vm3, %v1714_v32, 0.0  ;;  %v724_v34 = vpop.f32.mrb[1].mxu1 }
 0x1d2   : > { %v750_v35 = vsel %vm749_vm3, %v724_v34, 0.0  ;;  %v1837_v36 = vpack.i.bf16 %v1714_v32, %v724_v34  ;;  %vm802_vm3 = vcmp.eq.s32.totalorder %v2138_v59, %v786_v11 }
 0x1d3   : > { %v752_v37 = vpack.c.bf16 %v751_v33, %v750_v35  ;;  %v1619_v23 = vsel %vm802_vm3, 1.0, %v1925_v31  ;;  %v1623_v33 = vsel %vm806_vm7, 1.0, %v1925_v31  ;;  %vm1928_vm3 = vmmov 0  }
 0x1d4   : > { %1838 = vrot.lane.b32.xlu0 %v1837_v36, %s1926_s12 }
 0x1d5   : > { %754 = vst.msk [vmem:[#allocation4] sm:$0xff] %vm753_vm4, %v752_v37 }
 0x1d8   : > { %828 = vperm.xlu0 %1842, %v765_v38  }
 0x1dc   : > { %840 = vperm.xlu0 %1842, %v769_v39   ;;  %v958_v40 = vld [vmem:[#allocation4] sm:$0xff] }
 0x1dd   : > { %1725 = vmatprep.subr.bf16.mxu1 %v958_v40 }
 0x1de   : > { %1726 = vmatpush3.bf16.msra.mxu1 %v958_v40 }
 0x1e0   : > { %846 = vperm.xlu0 %1842, %v771_v41  }
 0x1e4   : > { %776 = vperm.xlu0 %1842, %v757_v42  }
 0x1e8   : > { %782 = vperm.xlu0 %1842, %v759_v43  }
 0x1ec   : > { %788 = vperm.xlu0 %1842, %v761_v44  }
 0x1f0   : > { %794 = vperm.xlu0 %1842, %v763_v45  }
 0x246   : > { %v1839_v50 = vpop.permute.xlu0 %1838 }
 0x247   : > { %v1841_v52 = vunpack.i.h.bf16 %v1839_v50  ;;  %v1840_v53 = vunpack.i.l.bf16 %v1839_v50 }
 0x249   : > { %v745_v54 = vsel %vm743_vm2, %v742_v49, %v1841_v52  ;;  %v744_v55 = vsel %vm743_vm2, %v741_v48, %v1840_v53  ;;  %v1640_v52 = vld [vmem:[%s524_s16] ss:$0 sm:$0xff] }
 0x24a   : > { %v746_v56 = vpack.c.bf16 %v745_v54, %v744_v55 }
 0x24c   : > { %748 = vst.msk [vmem:[#allocation3] sm:$0xff] %vm747_vm5, %v746_v56  ;;  %vm804_vm5 = vcmp.eq.s32.totalorder %v2138_v59, %v792_v19 }
 0x24d   : > { %v1621_v28 = vsel %vm804_vm5, 1.0, %v1925_v31 }
 0x253   : > { %v879_v61 = vld [vmem:[#allocation3] sm:$0xff] }
 0x254   : > { %1715 = vmatprep.subr.bf16.mxu0 %v879_v61 }
 0x255   : > { %1716 = vmatpush3.bf16.msra.mxu0 %v879_v61 }
 0x256   : > { %1735 = vmatprep.subr.bf16.mxu0 %v1925_v31 }
 0x257   : > { %v829_v62 = vpop.permute.xlu0 %828 }
 0x258   : > { %vm851_vm9 = vcmp.eq.s32.totalorder %v2138_v59, %v829_v62 }
 0x259   : > { %v1624_v3 = vsel %vm851_vm9, 1.0, %v1925_v31 }
 0x25a   : > { %v875_v4 = vpack.c.bf16 %v1625_v1, %v1624_v3 }
 0x25b   : > { %v841_v6 = vpop.permute.xlu0 %840 }
 0x25c   : > { %vm855_vm12 = vcmp.eq.s32.totalorder %v2138_v59, %v841_v6  ;;  %1717 = vmatprep.mubr.msk.bf16.mxu0 %vm880_vm10, %v875_v4 }
 0x25d   : > { %v1628_v9 = vsel %vm855_vm12, 1.0, %v1925_v31  ;;  %1718 = vmatmul.mubr.msk.bf16.vlgmr.msra.gmra.mrb[4].mxu0 %vm880_vm10, %v876_v5 }
 0x25e   : > { %v877_v10 = vpack.c.bf16 %v1629_v8, %v1628_v9 }
 0x25f   : > { %v847_v13 = vpop.permute.xlu0 %846 }
 0x260   : > { %vm857_vm14 = vcmp.eq.s32.totalorder %v2138_v59, %v847_v13  ;;  %1721 = vmatprep.mubr.msk.bf16.mxu0 %vm880_vm10, %v877_v10 }
 0x261   : > { %v1630_v15 = vsel %vm857_vm14, 1.0, %v1925_v31 }
 0x262   : > { %v878_v16 = vpack.c.bf16 %v1631_v14, %v1630_v15 }
 0x263   : > { %v777_v17 = vpop.permute.xlu0 %776 }
 0x264   : > { %vm799_vm0 = vcmp.eq.s32.totalorder %v2138_v59, %v777_v17 }
 0x265   : > { %v1616_v20 = vsel %vm799_vm0, 1.0, %v1925_v31  ;;  %1722 = vmatmul.mubr.msk.bf16.gmra.mrb[8].mxu0 %vm880_vm10, %v878_v16 }
 0x266   : > { %v2166_v21 = vpack.c.bf16 %v1617_v18, %v1616_v20  ;;  %1743 = vmatprep.mubr.msk.bf16.mxu0 %vm1928_vm3, %v1925_v31 }
 0x267   : > { %v783_v22 = vpop.permute.xlu0 %782 }
 0x268   : > { %vm801_vm4 = vcmp.eq.s32.totalorder %v2138_v59, %v783_v22  ;;  %1727 = vmatprep.mubr.msk.bf16.mxu1 %vm880_vm10, %v2166_v21 }
 0x269   : > { %v1618_v24 = vsel %vm801_vm4, 1.0, %v1925_v31  ;;  %vm1201_vm4 = vcmask 523264  }
 0x26a   : > { %v2174_v25 = vpack.c.bf16 %v1619_v23, %v1618_v24 }
 0x26b   : > { %v789_v27 = vpop.permute.xlu0 %788 }
 0x26c   : > { %vm803_vm6 = vcmp.eq.s32.totalorder %v2138_v59, %v789_v27  ;;  %1728 = vmatmul.mubr.msk.bf16.vlgmr.msra.gmra.mrb[4].mxu1 %vm880_vm10, %v2174_v25 }
 0x26d   : > { %v1620_v29 = vsel %vm803_vm6, 1.0, %v1925_v31 }
 0x26e   : > { %v2182_v30 = vpack.c.bf16 %v1621_v28, %v1620_v29 }
 0x26f   : > { %v795_v32 = vpop.permute.xlu0 %794 }
 0x270   : > { %vm805_vm8 = vcmp.eq.s32.totalorder %v2138_v59, %v795_v32  ;;  %1731 = vmatprep.mubr.msk.bf16.mxu1 %vm880_vm10, %v2182_v30 }
 0x271   : > { %v1622_v34 = vsel %vm805_vm8, 1.0, %v1925_v31 }
 0x272   : > { %v2189_v35 = vpack.c.bf16 %v1623_v33, %v1622_v34 }
 0x274   : > { %1732 = vmatmul.mubr.msk.bf16.gmra.mrb[8].mxu1 %vm880_vm10, %v2189_v35 }
 0x330   : > { %v2193_v36 = vpop.f32.mrb[4].mxu0 }
 0x331   : > { %v2195_v37 = vpop.f32.mrb[5].mxu0 }
 0x332   : > { %1044 = vrot.lane.b32.xlu0 %v2195_v37, %s1927_s18  ;;  %v2198_v38 = vpop.f32.mrb[6].mxu0 }
 0x333   : > { %v2200_v39 = vpop.f32.mrb[7].mxu0 }
 0x334   : > { %1046 = vrot.lane.b32.xlu1 %v2200_v39, %s1927_s18 }
 0x336   : > { %1048 = vrot.lane.b32.xlu0 %v2193_v36, %s1927_s18 }
 0x338   : > { %1050 = vrot.lane.b32.xlu1 %v2198_v38, %s1927_s18  ;;  %v2205_v40 = vpop.f32.mrb[8].mxu0 }
 0x339   : > { %v2207_v41 = vpop.f32.mrb[9].mxu0 }
 0x33a   : > { %1052 = vrot.lane.b32.xlu0 %v2207_v41, %s1927_s18  ;;  %v2210_v42 = vpop.f32.mrb[10].mxu0 }
 0x33b   : > { %v2212_v43 = vpop.f32.mrb[11].mxu0 }
 0x33c   : > { %1054 = vrot.lane.b32.xlu1 %v2212_v43, %s1927_s18 }
 0x33e   : > { %1056 = vrot.lane.b32.xlu0 %v2205_v40, %s1927_s18 }
 0x33f   : > { %v1729_v44 = vpop.f32.mrb[4].mxu1 }
 0x340   : > { %1058 = vrot.lane.b32.xlu1 %v2210_v42, %s1927_s18  ;;  %v1005_v45 = vpop.f32.mrb[5].mxu1 }
 0x341   : > { %v1730_v46 = vpop.f32.mrb[6].mxu1 }
 0x342   : > { %v1008_v47 = vpop.f32.mrb[7].mxu1 }
 0x347   : > { %v1733_v48 = vpop.f32.mrb[8].mxu1 }
 0x348   : > { %v1021_v49 = vpop.f32.mrb[9].mxu1 }
 0x349   : > { %v1734_v50 = vpop.f32.mrb[10].mxu1 }
 0x34a   : > { %v1024_v51 = vpop.f32.mrb[11].mxu1 }
 0x3a4   : > { %v1045_v53 = vpop.permute.xlu0 %1044 }
 0x3a5   : > { %v1068_v54 = vadd.f32 %v1045_v53, %v1005_v45 }
 0x3a6   : > { %v1047_v55 = vpop.permute.xlu1 %1046 }
 0x3a7   : > { %v1083_v56 = vadd.f32 %v1640_v52, %v1068_v54  ;;  %v1069_v57 = vadd.f32 %v1047_v55, %v1008_v47 }
 0x3a8   : > { %v1049_v58 = vpop.permute.xlu0 %1048 }
 0x3a9   : > { %v1084_v59 = vadd.f32 %v1640_v52, %v1069_v57  ;;  %v1070_v60 = vadd.f32 %v1729_v44, %v1049_v58  ;;  %v1099_v62 = vmul.f32 0.2, %v1083_v56  ;;  %vm1091_vm10 = vcmp.ge.f32.partialorder %v1083_v56, 0.0 }
 0x3aa   : > { %v1051_v61 = vpop.permute.xlu1 %1050 }
 0x3ab   : > { %vm1092_vm9 = vcmp.ge.f32.partialorder %v1084_v59, 0.0  ;;  %v1100_v63 = vmul.f32 0.2, %v1084_v59  ;;  %v1085_v0 = vadd.f32 %v1640_v52, %v1070_v60  ;;  %v1071_v1 = vadd.f32 %v1730_v46, %v1051_v61 }
 0x3ac   : > { %v1053_v2 = vpop.permute.xlu0 %1052  ;;  %v1107_v10 = vsel %vm1091_vm10, %v1083_v56, %v1099_v62 }
 0x3ad   : > { %v1108_v3 = vsel %vm1092_vm9, %v1084_v59, %v1100_v63  ;;  %vm1093_vm11 = vcmp.ge.f32.partialorder %v1085_v0, 0.0  ;;  %v1101_v4 = vmul.f32 0.2, %v1085_v0  ;;  %v1072_v5 = vadd.f32 %v1053_v2, %v1021_v49 }
 0x3ae   : > { %v1117_v6 = vmul.f32 1.442695, %v1108_v3  ;;  %v1086_v8 = vadd.f32 %v1640_v52, %v1071_v1  ;;  %v1055_v9 = vpop.permute.xlu1 %1054  ;;  %v1115_v20 = vmul.f32 1.442695, %v1107_v10 }
 0x3af   : > { %v1109_v11 = vsel %vm1093_vm11, %v1085_v0, %v1101_v4  ;;  %v1087_v13 = vadd.f32 %v1640_v52, %v1072_v5  ;;  %v1073_v14 = vadd.f32 %v1055_v9, %v1024_v51 }
 0x3b0   : > { %1846 = vpow2.f32 %v1117_v6  ;;  %v1119_v15 = vmul.f32 1.442695, %v1109_v11  ;;  %vm1094_vm12 = vcmp.ge.f32.partialorder %v1086_v8, 0.0  ;;  %v1102_v16 = vmul.f32 0.2, %v1086_v8  ;;  %v1057_v17 = vpop.permute.xlu0 %1056 }
 0x3b1   : > { %v1088_v18 = vadd.f32 %v1640_v52, %v1073_v14  ;;  %v1074_v19 = vadd.f32 %v1733_v48, %v1057_v17  ;;  %v1103_v27 = vmul.f32 0.2, %v1087_v13  ;;  %vm1095_vm14 = vcmp.ge.f32.partialorder %v1087_v13, 0.0 }
 0x3b2   : > { %1848 = vpow2.f32 %v1119_v15  ;;  %v1110_v22 = vsel %vm1094_vm12, %v1086_v8, %v1102_v16  ;;  %v1059_v23 = vpop.permute.xlu1 %1058 }
 0x3b3   : > { %v1121_v24 = vmul.f32 1.442695, %v1110_v22  ;;  %vm1096_vm13 = vcmp.ge.f32.partialorder %v1088_v18, 0.0  ;;  %v1104_v26 = vmul.f32 0.2, %v1088_v18  ;;  %v1089_v28 = vadd.f32 %v1640_v52, %v1074_v19  ;;  %v1285_v19 = vld [vmem:[%s2039_s11] sm:$0xff] }
 0x3b4   : > { %v1075_v29 = vadd.f32 %v1734_v50, %v1059_v23  ;;  %v1111_v45 = vsel %vm1095_vm14, %v1087_v13, %v1103_v27  ;;  %v1287_v22 = vld [vmem:[%s2039_s11 + $0x10] sm:$0xff]  ;;  %v1289_v27 = vld [vmem:[%s2039_s11 + $0x20] sm:$0xff] }
 0x3b5   : > { %1850 = vpow2.f32 %v1121_v24  ;;  %v1112_v32 = vsel %vm1096_vm13, %v1088_v18, %v1104_v26  ;;  %vm1097_vm15 = vcmp.ge.f32.partialorder %v1089_v28, 0.0  ;;  %v1105_v34 = vmul.f32 0.2, %v1089_v28  ;;  %v1288_v24 = vld [vmem:[%s2039_s11 + $0x18] sm:$0xff] }
 0x3b6   : > { %1852 = vpow2.f32 %v1115_v20  ;;  %v1125_v33 = vmul.f32 1.442695, %v1112_v32  ;;  %v1090_v44 = vadd.f32 %v1640_v52, %v1075_v29  ;;  %v1123_v51 = vmul.f32 1.442695, %v1111_v45  ;;  %v1286_v20 = vld [vmem:[%s2039_s11 + $0x8] sm:$0xff] }
 0x3b7   : > { %v1113_v46 = vsel %vm1097_vm15, %v1089_v28, %v1105_v34  ;;  %v1782_v23 = vpack.c.bf16 %v1286_v20, %v1285_v19  ;;  %v1786_v26 = vpack.c.bf16 %v1288_v24, %v1287_v22  ;;  %v1290_v28 = vld [vmem:[%s2039_s11 + $0x28] sm:$0xff]  ;;  %v1292_v34 = vld [vmem:[%s2039_s11 + $0x38] sm:$0xff] }
 0x3b8   : > { %1854 = vpow2.f32 %v1125_v33  ;;  %v1127_v47 = vmul.f32 1.442695, %v1113_v46  ;;  %vm1098_vm0 = vcmp.ge.f32.partialorder %v1090_v44, 0.0  ;;  %v1106_v48 = vmul.f32 0.2, %v1090_v44  ;;  %v1291_v33 = vld [vmem:[%s2039_s11 + $0x30] sm:$0xff] }
 0x3b9   : > { %1783 = vmatprep.subr.bf16.mxu1 %v1782_v23  ;;  %v1790_v29 = vpack.c.bf16 %v1290_v28, %v1289_v27 }
 0x3ba   : > { %v1847_v49 = vpop.eup %1846  ;;  %1856 = vpow2.f32 %v1127_v47  ;;  %v1114_v53 = vsel %vm1098_vm0, %v1090_v44, %v1106_v48  ;;  %1785 = vmatpush3.bf16.msra.mxu1 %v1782_v23  ;;  %v1794_v44 = vpack.c.bf16 %v1292_v34, %v1291_v33 }
 0x3bb   : > { %1138 = vperm.xlu1 %1843, %v1847_v49   ;;  %v1129_v54 = vmul.f32 1.442695, %v1114_v53  ;;  %1787 = vmatprep.subr.bf16.mxu1 %v1786_v26 }
 0x3bc   : > { %v1849_v50 = vpop.eup %1848 }
 0x3bd   : > { %1143 = vperm.xlu0 %1842, %v1849_v50   ;;  %1858 = vpow2.f32 %v1129_v54 }
 0x3be   : > { %1860 = vpow2.f32 %v1123_v51  ;;  %1789 = vmatpush3.bf16.msra.mxu1 %v1786_v26 }
 0x3bf   : > { %v1851_v55 = vpop.eup %1850  ;;  %1791 = vmatprep.subr.bf16.mxu1 %v1790_v29 }
 0x3c0   : > { %v1853_v56 = vpop.eup %1852  ;;  %1148 = vperm.xlu1 %1843, %v1851_v55   ;;  %v1642_v55 = vld [vmem:[%s532_s27] ss:$0 sm:$0xff] }
 0x3c1   : > { %1133 = vperm.xlu0 %1842, %v1853_v56  }
 0x3c2   : > { %v1855_v52 = vpop.eup %1854  ;;  %1793 = vmatpush3.bf16.msra.mxu1 %v1790_v29 }
 0x3c3   : > { %1795 = vmatprep.subr.bf16.mxu1 %v1794_v44 }
 0x3c4   : > { %1158 = vperm.xlu1 %1843, %v1855_v52   ;;  %v1857_v57 = vpop.eup %1856 }
 0x3c5   : > { %1163 = vperm.xlu0 %1842, %v1857_v57  }
 0x3c6   : > { %1797 = vmatpush3.bf16.msra.mxu1 %v1794_v44 }
 0x3c7   : > { %v1859_v58 = vpop.eup %1858 }
 0x3c8   : > { %v1861_v59 = vpop.eup %1860  ;;  %1168 = vperm.xlu1 %1843, %v1859_v58  }
 0x3c9   : > { %1153 = vperm.xlu0 %1842, %v1861_v59  }
 0x3e7   : > { %1185 = vxpose.xlu0.c.b16.start [1/4] (short) (narrow) %v2166_v21, 16 }
 0x3eb   : > { %1186 = vxpose.xlu0.c.b16.cont [2/4] (short) (narrow) %v2174_v25, 16 }
 0x3ef   : > { %1187 = vxpose.xlu0.c.b16.cont [3/4] (short) (narrow) %v2182_v30, 16 }
 0x3f3   : > { %1188 = vxpose.xlu0.c.b16.end [4/4] (short) (narrow) %v2189_v35, 16 }
 0x43a   : > { %v1139_v60 = vpop.permute.xlu1 %1138 }
 0x43b   : > { %v1172_v2 = vmul.f32 %v1139_v60, %v2200_v39 }
 0x43c   : > { %v1144_v61 = vpop.permute.xlu0 %1143 }
 0x43d   : > { %v1173_v63 = vmul.f32 %v2193_v36, %v1144_v61 }
 0x43f   : > { %v1149_v62 = vpop.permute.xlu1 %1148 }
 0x440   : > { %v1174_v0 = vmul.f32 %v2198_v38, %v1149_v62  ;;  %v1134_v1 = vpop.permute.xlu0 %1133 }
 0x441   : > { %v1171_v3 = vmul.f32 %v1134_v1, %v2195_v37 }
 0x442   : > { %v1180_v4 = vpack.c.bf16 %v1174_v0, %v1173_v63 }
 0x443   : > { %v1179_v21 = vpack.c.bf16 %v1172_v2, %v1171_v3  ;;  %v1159_v5 = vpop.permute.xlu1 %1158 }
 0x444   : > { %v1164_v25 = vpop.permute.xlu0 %1163  ;;  %v1176_v38 = vmul.f32 %v1159_v5, %v2212_v43 }
 0x445   : > { %1736 = vmatpush3.bf16.msra.mxu0 %v1179_v21  ;;  %v1177_v35 = vmul.f32 %v2205_v40, %v1164_v25  ;;  %v1929_v40 = vmov 32  }
 0x446   : > { %1737 = vmatprep.subr.bf16.mxu0 %v1925_v31  ;;  %1844 = vset.pattern.permute.xlu1 %v1929_v40 }
 0x447   : > { %v1169_v30 = vpop.permute.xlu1 %1168  ;;  %1845 = vset.pattern.permute.xlu0 %v1929_v40 }
 0x448   : > { %v1178_v6 = vmul.f32 %v2210_v42, %v1169_v30  ;;  %v1154_v36 = vpop.permute.xlu0 %1153  ;;  %v1183_v42 = vld [vmem:[#allocation5] sm:$0xff] }
 0x449   : > { %1738 = vmatpush3.bf16.msra.mxu0 %v1180_v4  ;;  %v1175_v39 = vmul.f32 %v1154_v36, %v2207_v41  ;;  %v1184_v41 = vld [vmem:[#allocation5 + $0x8] sm:$0xff] }
 0x44a   : > { %1739 = vmatprep.subr.bf16.mxu0 %v1925_v31  ;;  %v1182_v37 = vpack.c.bf16 %v1178_v6, %v1177_v35 }
 0x44b   : > { %v1181_v8 = vpack.c.bf16 %v1176_v38, %v1175_v39  ;;  %v1645_v38 = vld [vmem:[%s535_s30] ss:$0 sm:$0xff] }
 0x44d   : > { %1740 = vmatpush3.bf16.msra.mxu0 %v1181_v8  ;;  %v1193_v9 = vpop.trf.xlu0  ;;  %v1646_v8 = vld [vmem:[%s538_s3] ss:$0 sm:$0xff] }
 0x44e   : > { %1741 = vmatprep.subr.bf16.mxu0 %v1925_v31 }
 0x451   : > { %1742 = vmatpush3.bf16.msra.mxu0 %v1182_v37 }
 0x454   : > { %1744 = vmatmul.mubr.msk.bf16.vlgmr.msra.gmra.mrb[12].mxu0 %vm1201_vm4, %v1193_v9 }
 0x527   : > { %v1239_v43 = vpop.f32.mrb[12].mxu0 }
 0x528   : > { %v1246_v10 = vadd.f32 %v1239_v43, %v1183_v42  ;;  %v1745_v11 = vpop.f32.mrb[13].mxu0 }
 0x529   : > { %v1242_v13 = vpop.f32.mrb[14].mxu0 }
 0x52a   : > { %1249 = vst.msk [vmem:[#allocation5] sm:$0xff] %vm743_vm2, %v1246_v10  ;;  %v1247_v31 = vadd.f32 %v1242_v13, %v1184_v41  ;;  %v1746_v14 = vpop.f32.mrb[15].mxu0 }
 0x52c   : > { %1250 = vst.msk [vmem:[#allocation5 + $0x8] sm:$0xff] %vm743_vm2, %v1247_v31 }
 0x531   : > { %v1254_v15 = vld [vmem:[#allocation5] sm:$0xff] }
 0x532   : > { %v1256_v16 = vadd.f32 1e-20, %v1254_v15 }
 0x533   : > { %v1255_v17 = vld [vmem:[#allocation5 + $0x8] sm:$0xff] }
 0x534   : > { %1260 = vperm.xlu1 %1844, %v1256_v16   ;;  %v1257_v18 = vadd.f32 1e-20, %v1255_v17 }
 0x538   : > { %1265 = vperm.xlu1 %1844, %v1257_v18  }
 0x5b3   : > { %v1261_v32 = vpop.permute.xlu1 %1260 }
 0x5b4   : > { %1862 = vrcp.f32 %v1261_v32 }
 0x5b7   : > { %v1266_v45 = vpop.permute.xlu1 %1265 }
 0x5b8   : > { %1864 = vrcp.f32 %v1266_v45 }
 0x5be   : > { %v1863_v46 = vpop.eup %1862 }
 0x5bf   : > { %v1269_v47 = vmul.f32 %v1863_v46, %v1254_v15 }
 0x5c1   : > { %1276 = vrot.lane.b32.xlu1 %v1269_v47, %s1926_s12 }
 0x5c2   : > { %v1865_v48 = vpop.eup %1864 }
 0x5c3   : > { %v1271_v49 = vmul.f32 %v1865_v48, %v1255_v17 }
 0x5c5   : > { %1278 = vrot.lane.b32.xlu1 %v1271_v49, %s1926_s12 }
 0x633   : > { %v1277_v51 = vpop.permute.xlu1 %1276 }
 0x634   : > { %v1283_v53 = vsel %vm566_vm1, %v2060_v7, %v1277_v51 }
 0x635   : > { %1763 = vmatprep.mubr.msk.f32.mxu1 %vm1201_vm4, %v1283_v53 }
 0x637   : > { %v1279_v50 = vpop.permute.xlu1 %1278 }
 0x638   : > { %v1284_v54 = vsel %vm566_vm1, %v2066_v12, %v1279_v50 }
 0x639   : > { %1764 = vmatmul.mubr.msk.f32.vlgmr.msra.gmra.mrb[2].mxu1 %vm1201_vm4, %v1284_v54 }
 0x70c   : > { %v1765_v56 = vpop.f32.mrb[2].mxu1 }
 0x70d   : > { %v1378_v52 = vadd.f32 %v1765_v56, %v1642_v55  ;;  %v1372_v57 = vpop.f32.mrb[3].mxu1 }
 0x70e   : > { %v1373_v58 = vadd.f32 %v1642_v55, %v1372_v57 }
 0x70f   : > { %v1384_v59 = vsel %vm566_vm1, %v1378_v52, 0.0 }
 0x710   : > { %1385 = vadd.xlane.f32.xlu0 %v1384_v59  ;;  %v1381_v7 = vsel %vm566_vm1, %v1373_v58, 0.0 }
 0x711   : > { %1382 = vadd.xlane.f32.xlu1 %v1381_v7 }
 0x79d   : > { %v1386_v60 = vpop.xlane.xlu0 %1385 }
 0x79e   : > { %v1389_v61 = vmul.f32 0.03125, %v1386_v60  ;;  %v1383_v12 = vpop.xlane.xlu1 %1382 }
 0x79f   : > { %v1388_v62 = vmul.f32 0.03125, %v1383_v12 }
 0x7a0   : > { %v1391_v63 = vsub.f32 %v1378_v52, %v1389_v61 }
 0x7a1   : > { %v1390_v0 = vsub.f32 %v1373_v58, %v1388_v62 }
 0x7a2   : > { %v1393_v1 = vmul.f32 %v1391_v63, %v1391_v63 }
 0x7a3   : > { %v1392_v2 = vmul.f32 %v1390_v0, %v1390_v0 }
 0x7a4   : > { %v1397_v3 = vsel %vm566_vm1, %v1393_v1, 0.0 }
 0x7a5   : > { %1398 = vadd.xlane.f32.xlu0 %v1397_v3  ;;  %v1394_v4 = vsel %vm566_vm1, %v1392_v2, 0.0 }
 0x7a6   : > { %1395 = vadd.xlane.f32.xlu1 %v1394_v4 }
 0x832   : > { %v1399_v21 = vpop.xlane.xlu0 %1398 }
 0x833   : > { %v1401_v5 = vmul.f32 0.03125, %v1399_v21  ;;  %v1396_v25 = vpop.xlane.xlu1 %1395 }
 0x834   : > { %v1400_v30 = vmul.f32 0.03125, %v1396_v25 }
 0x835   : > { %v1403_v35 = vadd.f32 1e-05, %v1401_v5 }
 0x836   : > { %v1402_v6 = vadd.f32 1e-05, %v1400_v30 }
 0x837   : > { %1866 = vrsqrt.f32 %v1403_v35 }
 0x838   : > { %1868 = vrsqrt.f32 %v1402_v6 }
 0x841   : > { %v1867_v36 = vpop.eup %1866 }
 0x842   : > { %v1869_v39 = vpop.eup %1868  ;;  %v1407_v37 = vmul.f32 %v1867_v36, %v1391_v63 }
 0x843   : > { %v1406_v9 = vmul.f32 %v1869_v39, %v1390_v0  ;;  %1431 = sbr.rel (%p1647_p6) target bundleno = 2124 (0x84c), region = 80 }
 0x844   : > { %v1416_v40 = vmul.f32 %v1645_v38, %v1407_v37 }
 0x845   : > { %v1415_v42 = vmul.f32 %v1645_v38, %v1406_v9 }
 0x846   : > { %v1425_v43 = vadd.f32 %v1646_v8, %v1416_v40 }
 0x847   : > { %v1424_v41 = vadd.f32 %v1646_v8, %v1415_v42 }
 0x848   : > { %1427 = vst.msk [vmem:[#allocation6 + $0x8] sm:$0xff] %vm566_vm1, %v1425_v43  ;;  %v1433_v11 = vmax.f32 (!%p1647_p6), %v1425_v43, 0.0 }
 0x849   : > { %1426 = vst.msk [vmem:[#allocation6] sm:$0xff] %vm566_vm1, %v1424_v41  ;;  %v1432_v10 = vmax.f32 (!%p1647_p6), %v1424_v41, 0.0 }
 0x84a   : > { %1435 = vst.msk [vmem:[#allocation2 + $0x8] sm:$0xff] %vm566_vm1, %v1433_v11 }
 0x84b   : > { %1434 = vst.msk [vmem:[#allocation2] sm:$0xff] %vm566_vm1, %v1432_v10 }
 0x84c PF: > { %p1648_p7 = scmp.ne.s32.totalorder %s1914_s17, 1 }
 0x84d   : > { %1440 = vst.msk [vmem:[#allocation2] sm:$0xff] (!%p1648_p7), %vm566_vm1, %v1424_v41  ;;  %1441 = vst.msk [vmem:[#allocation2 + $0x8] sm:$0xff] (!%p1648_p7), %vm566_vm1, %v1425_v43 }
 0x84e   : > { %1439 = sbr.rel (%p1648_p7) target bundleno = 2133 (0x855), region = 84 }
 0x855 PF: > { %s2341_s3 = sadd.s32 4294967295, %s1922_s19   ;;  %s1930_s30 = smov [#allocation6]  }
 0x856   : > { %p2286_p8 = scmp.eq.s32.totalorder %s2341_s3, 1  ;;  %s1448_s24 = sshll.u32 %s1930_s30, 4  ;;  %s1449_s24 = int_to_ptr.vmem [resolvable:$true] %s1448_s24 }
 0x857   : > { %s1870_s25 = scalar_lea.vmem %s1449_s24, 256  ;;  %p1877_p12 = scmp.lt.s32.totalorder %s1449_s24, %s1449_s24 }
 0x858   : > { %p1871_p9 = scmp.ne.s32.totalorder %s1449_s24, %s1870_s25  ;;  %p1878_p13 = scmp.lt.s32.totalorder %s1870_s25, %s1870_s25 }
 0x85a   : > { %p1872_p10 = pnand %p1871_p9, %p2286_p8  ;;  %p1879_p0 = por %p1878_p13, %p1877_p12 }
 0x85c   : > { %p1873_p11 = pneg %p1872_p10 }
 0x85e   : > { %p1880_p1 = pnand %p1879_p0, %p1873_p11 }
 0x860   : > { %1883 = shalt.err (!%p1880_p1)
}
 0x861   : > { %s2343_s13 = sld [smem:[#allocation12_spill]] }
 0x867   : > { %s1884_s23 = scalar_lea.hbm %s2343_s13, 256 }
 0x868   : > { %p1885_p2 = scmp.ne.s32.totalorder %s2343_s13, %s1884_s23  ;;  %p1890_p5 = scmp.lt.u32.totalorder %s1884_s23, %s2343_s13 }
 0x86a   : > { %p1886_p3 = pnand %p1885_p2, %p2286_p8 }
 0x86c   : > { %p1887_p4 = pneg %p1886_p3 }
 0x86e   : > { %p1892_p6 = pnand %p1890_p5, %p1887_p4 }
 0x870   : > { %1895 = shalt.err (!%p1892_p6)
}
 0x871   : > { %s1931_s21 = smov 128   ;;  %s1932_s11 = smov 8  }
 0x872   : > { %1799 = dma.vmem_to_hbm [thread:$0]  (%p2286_p8), %s1449_s24, 256, %s2343_s13, [#allocation7], %s1931_s21, %s1931_s21, %s1932_s11  }
 0x873   : > { %1909 = dma.done.wait (%p2286_p8), [#allocation7], 256  }
 0x874   : > { %1911 = vsyncadd (%p2286_p8), [#allocation7], 4294967040 }
 0x875 PF: > { %s22_s19 = sadd.s32 1, %s1922_s19   ;;  %s2344_s17 = sld [smem:[#allocation9_spill]] }
 0x876   : > { %p19_p7 = scmp.ge.s32.totalorder %s22_s19, 4   ;;  %s2345_s18 = sld [smem:[#allocation10_spill]] }
 0x878   :  { %21 = sbr.rel (!%p19_p7) target bundleno = 5 (0x5), region = 138 }
 0x87f   :  { %1464 = vsyncpa [#allocation7], 1 }
 0x880   :  { %1466 = vsyncpa [#allocation7 + $0x1], 1 }

</bundles_post_ra>
